<compile_context>
chip_gen: v7x
topology: tpu7x:2x2x1
jax: 0.10.0
libtpu: 0.0.40
codegen_flags: <defaults>
</compile_context>

<pallas_src>
import jax
import jax.numpy as jnp
from jax.experimental import pallas as pl
from jax.experimental.pallas import tpu as pltpu

# Module hyper-parameters (from Network.__init__)
C_IN = 60
C_OUT = 60
KSIZE = 3
DILATION = 2
PAD = (KSIZE - 1) * DILATION      # 4 left zeros; the conv's right pad is cropped away
LANE = 128                        # TPU lane width
MAX_BLOCK_LANES = 4096            # cap on Bb * Tp (VMEM / per-step-overhead balance)
MAX_BATCH_UNROLL = 8              # cap on the in-kernel static batch loop


def _causal_conv_kernel(pos_ref, x_ref, w_ref, b_ref, o_ref):
    # pos_ref: (1, Tp)      int32  time index of each lane
    # x_ref:   (Bb, 60, Tp) f32    input block (batch, channel-sublanes, time-lanes)
    # w_ref:   (3, 60, 60)  f32    w_ref[k, o, c] = weight[o, c, k]
    # b_ref:   (60, 128)    f32    bias replicated across one vreg of lanes
    # o_ref:   (Bb, 60, Tp) f32    output block
    bb, _, tp = x_ref.shape

    # Hoisted out of the batch loop: causal masks for the two shifted taps,
    # the per-tap weight tiles and the bias column.
    posb = jnp.broadcast_to(pos_ref[...], (C_IN, tp))
    mask2 = posb >= DILATION          # tap k=1 reads x[t - 2]
    mask4 = posb >= PAD               # tap k=0 reads x[t - 4]
    w0 = w_ref[0]                     # (60, 60)
    w1 = w_ref[1]
    w2 = w_ref[2]
    bias_col = b_ref[...][:, 0:1]     # (60, 1)

    for b in range(bb):               # static unroll; Bb is small by construction
        x = x_ref[b]                  # (60, Tp) f32
        # Shifted taps: roll runs on the (otherwise idle) XLU; the wrap-around
        # columns are exactly the causally-padded region (pos < shift) -> zeroed.
        x2 = jnp.where(mask2, pltpu.roll(x, DILATION, axis=1), jnp.zeros_like(x))
        x4 = jnp.where(mask4, pltpu.roll(x, PAD, axis=1), jnp.zeros_like(x))
        acc = jnp.dot(w2, x, preferred_element_type=jnp.float32)
        acc = acc + jnp.dot(w1, x2, preferred_element_type=jnp.float32)
        acc = acc + jnp.dot(w0, x4, preferred_element_type=jnp.float32)
        o_ref[b] = (acc + bias_col).astype(o_ref.dtype)


def _pick_batch_block(B, Tp):
    """Largest divisor of B such that the block stays within the lane/unroll
    budget; prefer an even number (>= 2) of blocks so both v7x TensorCores are
    fed by the "parallel" grid axis."""
    cands = [d for d in range(1, B + 1)
             if B % d == 0 and d * Tp <= MAX_BLOCK_LANES and d <= MAX_BATCH_UNROLL]
    if not cands:
        return 1
    pref = [d for d in cands if (B // d) >= 2 and (B // d) % 2 == 0]
    return max(pref) if pref else max(cands)


def causal_conv1d(x, weight, bias):
    """x: (B, 60, T); weight: (60, 60, 3); bias: (60,). Returns (B, 60, T)."""
    B, c_in, T = x.shape
    assert c_in == C_IN
    in_dtype = x.dtype

    # Lane-align time (unmasked stores, aligned rolls). Right-padding with zeros
    # is causally harmless: padded outputs are cropped, and the roll wrap-around
    # only ever lands in the masked (pos < shift) region.
    Tp = ((T + LANE - 1) // LANE) * LANE
    xp = x.astype(jnp.float32)
    if Tp != T:
        xp = jnp.pad(xp, ((0, 0), (0, 0), (0, Tp - T)))

    Bb = _pick_batch_block(B, Tp)
    grid = (B // Bb,)

    pos = jnp.arange(Tp, dtype=jnp.int32)[None, :]                     # (1, Tp)
    w_k = jnp.transpose(weight.astype(jnp.float32), (2, 0, 1))         # (3, 60, 60)
    b2 = jnp.broadcast_to(bias.astype(jnp.float32)[:, None], (C_OUT, LANE))

    out = pl.pallas_call(
        _causal_conv_kernel,
        out_shape=jax.ShapeDtypeStruct((B, C_OUT, Tp), jnp.float32),
        grid_spec=pltpu.PrefetchScalarGridSpec(
            num_scalar_prefetch=0,
            grid=grid,
            in_specs=[
                pl.BlockSpec((1, Tp), lambda g: (0, 0)),               # pos
                pl.BlockSpec((Bb, C_IN, Tp), lambda g: (g, 0, 0)),     # x
                pl.BlockSpec((KSIZE, C_OUT, C_IN), lambda g: (0, 0, 0)),  # weights
                pl.BlockSpec((C_OUT, LANE), lambda g: (0, 0)),         # bias
            ],
            out_specs=pl.BlockSpec((Bb, C_OUT, Tp), lambda g: (g, 0, 0)),
        ),
        compiler_params=pltpu.CompilerParams(dimension_semantics=("parallel",)),
    )(pos, xp, w_k, b2)

    y = out if Tp == T else out[:, :, :T]
    return y.astype(in_dtype)


def reference_causal_conv1d(x, weight, bias):
    """Pure-JAX reference matching PyTorch Conv1d(pad=PAD, dil=2) then [:, :, :-PAD]."""
    B, _, T = x.shape
    x_pad = jnp.pad(x, ((0, 0), (0, 0), (PAD, 0)))
    out = jnp.zeros((B, C_OUT, T), jnp.float32)
    for k in range(KSIZE):
        xk = x_pad[:, :, k * DILATION: k * DILATION + T]
        out = out + jnp.einsum("oc,bct->bot", weight[:, :, k], xk)
    return out + bias[None, :, None]


if __name__ == "__main__":
    key = jax.random.PRNGKey(0)
    kx, kw, kb = jax.random.split(key, 3)

    # PyTorch Conv1d default init: U(-1/sqrt(fan_in), 1/sqrt(fan_in)).
    bound = (C_IN * KSIZE) ** -0.5
    weight = jax.random.uniform(kw, (C_OUT, C_IN, KSIZE),
                                minval=-bound, maxval=bound, dtype=jnp.float32)
    bias = jax.random.uniform(kb, (C_OUT,),
                              minval=-bound, maxval=bound, dtype=jnp.float32)

    conv = jax.jit(causal_conv1d)

    # Small shapes consistent with the module (C=60):
    #   (2, 128): lane-aligned T, 2 parallel blocks (both v7x TCs).
    #   (4,  96): exercises time padding/cropping and a 2-batch block.
    #   (3, 200): exercises padding plus a single-block 3-way batch unroll.
    for (B, T) in [(2, 128), (4, 96), (3, 200)]:
        x = jax.random.normal(jax.random.fold_in(kx, 1000 * B + T),
                              (B, C_IN, T), dtype=jnp.float32)
        y = jax.block_until_ready(conv(x, weight, bias))
        y_ref = reference_causal_conv1d(x, weight, bias)
        assert y.shape == (B, C_OUT, T)
        assert jnp.allclose(y, y_ref, atol=2e-2, rtol=2e-2), (
            B, T, float(jnp.max(jnp.abs(y - y_ref))))

    print("KERNEL_OK")
</pallas_src>

<mosaic_0001>
module attributes {stable_mosaic.version = 11 : i64} {
  func.func @_causal_conv_kernel(%arg0: i32, %arg1: memref<1x128xi32, #tpu.memory_space<vmem>>, %arg2: memref<1x60x128xf32, #tpu.memory_space<vmem>>, %arg3: memref<3x60x60xf32, #tpu.memory_space<vmem>>, %arg4: memref<60x128xf32, #tpu.memory_space<vmem>>, %arg5: memref<1x60x128xf32, #tpu.memory_space<vmem>>) attributes {dimension_semantics = [#tpu.dimension_semantics<parallel>], iteration_bounds = array<i64: 2>, scalar_prefetch = 0 : i64, scratch_operands = 0 : i64, tpu.core_type = #tpu.core_type<tc>, window_params = [{pipeline_mode = #tpu.pipeline_mode<synchronous>, transform_indices = @transform_0, window_bounds = array<i64: 1, 128>}, {transform_indices = @transform_1, window_bounds = array<i64: 1, 60, 128>}, {pipeline_mode = #tpu.pipeline_mode<synchronous>, transform_indices = @transform_2, window_bounds = array<i64: 3, 60, 60>}, {pipeline_mode = #tpu.pipeline_mode<synchronous>, transform_indices = @transform_3, window_bounds = array<i64: 60, 128>}, {transform_indices = @transform_4, window_bounds = array<i64: 1, 60, 128>}]} {
    %c0 = arith.constant 0 : index
    %c0_0 = arith.constant 0 : index
    %0 = vector.load %arg1[%c0, %c0_0] : memref<1x128xi32, #tpu.memory_space<vmem>>, vector<1x128xi32>
    %1 = vector.shape_cast %0 : vector<1x128xi32> to vector<1x128xi32>
    %2 = vector.broadcast %1 : vector<1x128xi32> to vector<60x128xi32>
    %c2_i32 = arith.constant 2 : i32
    %3 = vector.broadcast %c2_i32 : i32 to vector<60x128xi32>
    %4 = arith.cmpi sge, %2, %3 : vector<60x128xi32>
    %c4_i32 = arith.constant 4 : i32
    %5 = vector.broadcast %c4_i32 : i32 to vector<60x128xi32>
    %6 = arith.cmpi sge, %2, %5 : vector<60x128xi32>
    %c0_1 = arith.constant 0 : index
    %c0_2 = arith.constant 0 : index
    %c0_3 = arith.constant 0 : index
    %7 = vector.load %arg3[%c0_1, %c0_2, %c0_3] : memref<3x60x60xf32, #tpu.memory_space<vmem>>, vector<1x60x60xf32>
    %8 = vector.shape_cast %7 : vector<1x60x60xf32> to vector<60x60xf32>
    %c1 = arith.constant 1 : index
    %c0_4 = arith.constant 0 : index
    %c0_5 = arith.constant 0 : index
    %9 = vector.load %arg3[%c1, %c0_4, %c0_5] : memref<3x60x60xf32, #tpu.memory_space<vmem>>, vector<1x60x60xf32>
    %10 = vector.shape_cast %9 : vector<1x60x60xf32> to vector<60x60xf32>
    %c2 = arith.constant 2 : index
    %c0_6 = arith.constant 0 : index
    %c0_7 = arith.constant 0 : index
    %11 = vector.load %arg3[%c2, %c0_6, %c0_7] : memref<3x60x60xf32, #tpu.memory_space<vmem>>, vector<1x60x60xf32>
    %12 = vector.shape_cast %11 : vector<1x60x60xf32> to vector<60x60xf32>
    %c0_8 = arith.constant 0 : index
    %c0_9 = arith.constant 0 : index
    %13 = vector.load %arg4[%c0_8, %c0_9] : memref<60x128xf32, #tpu.memory_space<vmem>>, vector<60x128xf32>
    %14 = vector.extract_strided_slice %13 {offsets = [0, 0], sizes = [60, 1], strides = [1, 1]} : vector<60x128xf32> to vector<60x1xf32>
    %c0_10 = arith.constant 0 : index
    %c0_11 = arith.constant 0 : index
    %c0_12 = arith.constant 0 : index
    %15 = vector.load %arg2[%c0_10, %c0_11, %c0_12] : memref<1x60x128xf32, #tpu.memory_space<vmem>>, vector<1x60x128xf32>
    %16 = vector.shape_cast %15 : vector<1x60x128xf32> to vector<60x128xf32>
    %c2_i32_13 = arith.constant 2 : i32
    %17 = tpu.dynamic_rotate %16 by %c2_i32_13 dim 1 : vector<60x128xf32>, i32 -> vector<60x128xf32>
    %cst = arith.constant 0.000000e+00 : f32
    %18 = vector.broadcast %cst : f32 to vector<60x128xf32>
    %19 = arith.select %4, %17, %18 : vector<60x128xi1>, vector<60x128xf32>
    %c4_i32_14 = arith.constant 4 : i32
    %20 = tpu.dynamic_rotate %16 by %c4_i32_14 dim 1 : vector<60x128xf32>, i32 -> vector<60x128xf32>
    %cst_15 = arith.constant 0.000000e+00 : f32
    %21 = vector.broadcast %cst_15 : f32 to vector<60x128xf32>
    %22 = arith.select %6, %20, %21 : vector<60x128xi1>, vector<60x128xf32>
    %cst_16 = arith.constant dense<0.000000e+00> : vector<60x128xf32>
    %23 = tpu.matmul %12, %16, %cst_16 {dimension_numbers = #tpu.dot_dimension_numbers<[1], [0], [0], [1], [0, 0, 1, 1], [], []>} : vector<60x60xf32>, vector<60x128xf32>, vector<60x128xf32> -> vector<60x128xf32>
    %cst_17 = arith.constant dense<0.000000e+00> : vector<60x128xf32>
    %24 = tpu.matmul %10, %19, %cst_17 {dimension_numbers = #tpu.dot_dimension_numbers<[1], [0], [0], [1], [0, 0, 1, 1], [], []>} : vector<60x60xf32>, vector<60x128xf32>, vector<60x128xf32> -> vector<60x128xf32>
    %25 = arith.addf %23, %24 : vector<60x128xf32>
    %cst_18 = arith.constant dense<0.000000e+00> : vector<60x128xf32>
    %26 = tpu.matmul %8, %22, %cst_18 {dimension_numbers = #tpu.dot_dimension_numbers<[1], [0], [0], [1], [0, 0, 1, 1], [], []>} : vector<60x60xf32>, vector<60x128xf32>, vector<60x128xf32> -> vector<60x128xf32>
    %27 = arith.addf %25, %26 : vector<60x128xf32>
    %28 = vector.broadcast %14 : vector<60x1xf32> to vector<60x128xf32>
    %29 = arith.addf %27, %28 : vector<60x128xf32>
    %c0_19 = arith.constant 0 : index
    %c0_20 = arith.constant 0 : index
    %c0_21 = arith.constant 0 : index
    %30 = vector.load %arg5[%c0_19, %c0_20, %c0_21] : memref<1x60x128xf32, #tpu.memory_space<vmem>>, vector<1x60x128xf32>
    %31 = vector.shape_cast %30 : vector<1x60x128xf32> to vector<60x128xf32>
    %32 = vector.shape_cast %29 : vector<60x128xf32> to vector<1x60x128xf32>
    tpu.vector_store %arg5[%c0_19, %c0_20, %c0_21], %32 {strides = array<i32>} : memref<1x60x128xf32, #tpu.memory_space<vmem>>, vector<1x60x128xf32>,
    return
  }
  func.func @transform_0(%arg0: i32) -> (i32, i32) {
    %c0_i32 = arith.constant 0 : i32
    %c0_i32_0 = arith.constant 0 : i32
    %c0_i32_1 = arith.constant 0 : i32
    return %c0_i32, %c0_i32_0 : i32, i32
  }
  func.func @transform_1(%arg0: i32) -> (i32, i32, i32) {
    %c0_i32 = arith.constant 0 : i32
    %c0_i32_0 = arith.constant 0 : i32
    %c0_i32_1 = arith.constant 0 : i32
    return %arg0, %c0_i32, %c0_i32_0 : i32, i32, i32
  }
  func.func @transform_2(%arg0: i32) -> (i32, i32, i32) {
    %c0_i32 = arith.constant 0 : i32
    %c0_i32_0 = arith.constant 0 : i32
    %c0_i32_1 = arith.constant 0 : i32
    %c0_i32_2 = arith.constant 0 : i32
    return %c0_i32, %c0_i32_0, %c0_i32_1 : i32, i32, i32
  }
  func.func @transform_3(%arg0: i32) -> (i32, i32) {
    %c0_i32 = arith.constant 0 : i32
    %c0_i32_0 = arith.constant 0 : i32
    %c0_i32_1 = arith.constant 0 : i32
    return %c0_i32, %c0_i32_0 : i32, i32
  }
  func.func @transform_4(%arg0: i32) -> (i32, i32, i32) {
    %c0_i32 = arith.constant 0 : i32
    %c0_i32_0 = arith.constant 0 : i32
    %c0_i32_1 = arith.constant 0 : i32
    return %arg0, %c0_i32, %c0_i32_0 : i32, i32, i32
  }
}

</mosaic_0001>

<bundles_post_ra>
// kernel: causal_conv1d.1
= control target key start
LH: loop header
LB: loop body
LE: loop exit
PB: predicated region body
PF: predicated region fallthrough
CT: control target
= control target key end

     0   :  { %s1196_s15 = smov 0   ;;  %s1420_s0 = inlined_call_operand.vmem [shape: s32[1,128], index: 0, kind: input, shape index: {}]   ;;  %s1421_s1 = inlined_call_operand.vmem [shape: f32[2,60,128], index: 1, kind: input, shape index: {}]   ;;  %s1422_s2 = inlined_call_operand.vmem [shape: f32[3,60,60], index: 2, kind: input, shape index: {}]   ;;  %s1423_s3 = inlined_call_operand.vmem [shape: f32[60,128], index: 3, kind: input, shape index: {}]   ;;  %s1424_s4 = inlined_call_operand.vmem [shape: f32[2,60,128], index: 4, kind: output, shape index: {}]  }
   0x1 LB: > { %s812_s16 = sadd.s32 4294967295, %s1165_s15   ;;  %p816_p0 = scmp.ge.s32.totalorder %s1165_s15, 1  ;;  %s1165_s15 = sphi %s1196_s15, %s14_s15  }
   0x2   : > { %p162_p1 = scmp.lt.s32.totalorder %s1165_s15, 3 }
   0x4   : > { %p163_p2 = pnand %p816_p0, %p162_p1 }
   0x5   : > { %p188_p3 = scmp.lt.s32.totalorder (!%p163_p2), %s812_s16, 1  ;;  %v830_v11 = vld [vmem:[%s1422_s2 + $0x80] sm:$0xff] (!%p163_p2)  ;;  %vm295_vm0 = vcmask (!%p163_p2), 490496   ;;  %s1167_s23 = smov (!%p163_p2), 2   ;;  %vm320_vm1 = vcmask (!%p163_p2), 1043456   ;;  %vm1168_vm2 = vmmov (!%p163_p2), 1  }
   0x6   : > { %166 = sbr.rel (%p163_p2) target bundleno = 392 (0x188), region = 36  ;;  %975 = vmatprep.mubr.msk.f32.mxu0 (!%p163_p2), %vm295_vm0, %v830_v11  ;;  %v822_v16 = vld [vmem:[%s1422_s2 + $0x40] sm:$0xff] (!%p163_p2)  ;;  %vm1052_vm3 = vmpackc.low (!%p163_p2), %vm320_vm1, %vm1168_vm2  ;;  %s1169_s26 = smov (!%p163_p2), 4   ;;  %v831_v18 = vld [vmem:[%s1422_s2 + $0x88] sm:$0xff] (!%p163_p2)  ;;  %v1170_v28 = vmov (!%p163_p2), 0  }
   0x7   : > { %947 = vmatprep.mubr.msk.f32.mxu1 (!%p163_p2), %vm295_vm0, %v822_v16  ;;  %v832_v19 = vld [vmem:[%s1422_s2 + $0x90] sm:$0xff] (!%p163_p2)  ;;  %v833_v20 = vld [vmem:[%s1422_s2 + $0x98] sm:$0xff] (!%p163_p2)  ;;  %v834_v21 = vld [vmem:[%s1422_s2 + $0xa0] sm:$0xff] (!%p163_p2)  ;;  %1158 = vset.pattern.permute.xlu1 (!%p163_p2), %v1170_v28 }
   0x8   : > { %v835_v22 = vld [vmem:[%s1422_s2 + $0xa8] sm:$0xff] (!%p163_p2)  ;;  %v836_v23 = vld [vmem:[%s1422_s2 + $0xb0] sm:$0xff] (!%p163_p2)  ;;  %v837_v24 = vld [vmem:[%s1422_s2 + $0xb8] sm:$0xf] (!%p163_p2)  ;;  %1157 = vset.pattern.permute.xlu0 (!%p163_p2), %v1170_v28 }
   0x9   : > { %v205_v25 = vld [vmem:[%s1422_s2] sm:$0xff] (!%p163_p2)  ;;  %v232_v26 = vld [vmem:[%s1423_s3 + $0x8] sm:$0xff] (!%p163_p2)  ;;  %v233_v29 = vld [vmem:[%s1423_s3 + $0x10] sm:$0xff] (!%p163_p2) }
   0xa   : > { %v231_v27 = vld [vmem:[%s1423_s3] sm:$0xff] (!%p163_p2)  ;;  %v234_v30 = vld [vmem:[%s1423_s3 + $0x18] sm:$0xff] (!%p163_p2)  ;;  %v236_v32 = vld [vmem:[%s1423_s3 + $0x28] sm:$0xff] (!%p163_p2) }
   0xb   : > { %v235_v31 = vld [vmem:[%s1423_s3 + $0x20] sm:$0xff] (!%p163_p2)  ;;  %v237_v33 = vld [vmem:[%s1423_s3 + $0x30] sm:$0xff] (!%p163_p2)  ;;  %v238_v34 = vld [vmem:[%s1423_s3 + $0x38] sm:$0xf] (!%p163_p2) }
   0xc   : > { %v821_v35 = vld [vmem:[%s1420_s0] ss:$0 sm:$0xff] (!%p163_p2)  ;;  %v825_v11 = vld [vmem:[%s1422_s2 + $0x58] sm:$0xff] (!%p163_p2)  ;;  %v207_v16 = vld [vmem:[%s1422_s2 + $0x10] sm:$0xff] (!%p163_p2) }
   0xd   : > { %s1432_s16 = smov (!%p188_p3, %s812_s16), 1  ;;  %vm203_vm4 = vcmp.ge.s32.totalorder %v821_v35, 2  ;;  %vm204_vm6 = vcmp.ge.s32.totalorder %v821_v35, 4 }
   0xe   : > { %s881_s17 = sshll.u32 %s1432_s16, 6  ;;  %vm1282_vm5 = vmpackc.low %vm203_vm4, %vm203_vm4 }
   0xf   : > { %s192_s20 = scalar_lea.vmem %s1421_s1, %s881_s17  ;;  %vm1295_vm7 = vmpackc.low %vm204_vm6, %vm204_vm6  ;;  %s1407_s22 = scalar_lea.vmem %s1424_s4, %s881_s17 }
  0x10   : > { %v239_v0 = vld [vmem:[%s192_s20] sm:$0xff]  ;;  %v240_v1 = vld [vmem:[%s192_s20 + $0x8] sm:$0xff]  ;;  %v241_v5 = vld [vmem:[%s192_s20 + $0x10] sm:$0xff] }
  0x11   : > { %v243_v2 = vld [vmem:[%s192_s20 + $0x20] sm:$0xff]  ;;  %v1117_v3 = vpack.i.bf16 %v240_v1, %v239_v0  ;;  %v244_v4 = vld [vmem:[%s192_s20 + $0x28] sm:$0xff]  ;;  %v242_v6 = vld [vmem:[%s192_s20 + $0x18] sm:$0xff]  ;;  %v1039_v7 = vpack.c.bf16 %v240_v1, %v239_v0 }
  0x12   : > { %v1127_v8 = vpack.i.bf16 %v244_v4, %v243_v2  ;;  %v245_v9 = vld [vmem:[%s192_s20 + $0x30] sm:$0xff]  ;;  %v246_v10 = vld [vmem:[%s192_s20 + $0x38] sm:$0xf]  ;;  %v1122_v12 = vpack.i.bf16 %v242_v6, %v241_v5  ;;  %v1043_v13 = vpack.c.bf16 %v242_v6, %v241_v5  ;;  %v1047_v15 = vpack.c.bf16 %v244_v4, %v243_v2  ;;  %vm1034_vm8 = vmpackc.low %vm320_vm1, %vm203_vm4 }
  0x13   : > { %1118 = vrot.lane.b32.xlu0 %v1117_v3, %s1167_s23  ;;  %1040 = vmatprep.subr.bf16.mxu0 %v1039_v7  ;;  %v1132_v14 = vpack.i.bf16 %v245_v9, %v246_v10  ;;  %v1051_v17 = vpack.c.bf16 %v246_v10, %v245_v9  ;;  %v824_v9 = vld [vmem:[%s1422_s2 + $0x50] sm:$0xff]  ;;  %vm1329_vm9 = vmpackc.low %vm320_vm1, %vm204_vm6 }
  0x14   : > { %1128 = vrot.lane.b32.xlu1 %v1127_v8, %s1167_s23  ;;  %1042 = vmatpush3.bf16.msra.mxu0 %v1039_v7  ;;  %v823_v7 = vld [vmem:[%s1422_s2 + $0x48] sm:$0xff] }
  0x15   : > { %1044 = vmatprep.subr.bf16.mxu0 %v1043_v13 }
  0x17   : > { %1123 = vrot.lane.b32.xlu0 %v1122_v12, %s1167_s23 }
  0x18   : > { %1133 = vrot.lane.b32.xlu1 %v1132_v14, %s1167_s23  ;;  %1046 = vmatpush3.bf16.msra.mxu0 %v1043_v13  ;;  %v827_v13 = vld [vmem:[%s1422_s2 + $0x68] sm:$0xff] }
  0x19   : > { %1048 = vmatprep.subr.bf16.mxu0 %v1047_v15 }
  0x1b   : > { %1138 = vrot.lane.b32.xlu0 %v1117_v3, %s1169_s26 }
  0x1c   : > { %1143 = vrot.lane.b32.xlu1 %v1122_v12, %s1169_s26  ;;  %1050 = vmatpush3.bf16.msra.mxu0 %v1047_v15  ;;  %v826_v12 = vld [vmem:[%s1422_s2 + $0x60] sm:$0xff]  ;;  %v828_v15 = vld [vmem:[%s1422_s2 + $0x70] sm:$0xff] }
  0x1d   : > { %1053 = vmatprep.subr.msk.bf16.mxu0 %vm1052_vm3, %v1051_v17 }
  0x1f   : > { %1148 = vrot.lane.b32.xlu0 %v1127_v8, %s1169_s26 }
  0x20   : > { %1153 = vrot.lane.b32.xlu1 %v1132_v14, %s1169_s26  ;;  %1056 = vmatpush3.bf16.msk.msra.mxu0 %vm1052_vm3, %v1051_v17  ;;  %v206_v14 = vld [vmem:[%s1422_s2 + $0x8] sm:$0xff]  ;;  %v829_v17 = vld [vmem:[%s1422_s2 + $0x78] sm:$0xf] }
  0x23   : > { %976 = vmatmul.mubr.msk.f32.vlgmr.msra.gmra.mrb[0].mxu0 %vm295_vm0, %v831_v18  ;;  %703 = vperm.xlu0 %1157, %v231_v27   ;;  %v208_v18 = vld [vmem:[%s1422_s2 + $0x18] sm:$0xff] }
  0x24   : > { %978 = vmatprep.mubr.msk.f32.mxu0 %vm295_vm0, %v832_v19  ;;  %708 = vperm.xlu1 %1158, %v232_v26   ;;  %v209_v19 = vld [vmem:[%s1422_s2 + $0x20] sm:$0xff] }
  0x27   : > { %979 = vmatmul.mubr.msk.f32.gmra.mrb[2].mxu0 %vm295_vm0, %v833_v20  ;;  %718 = vperm.xlu0 %1157, %v234_v30   ;;  %v210_v20 = vld [vmem:[%s1422_s2 + $0x28] sm:$0xff] }
  0x28   : > { %981 = vmatprep.mubr.msk.f32.mxu0 %vm295_vm0, %v834_v21  ;;  %713 = vperm.xlu1 %1158, %v233_v29   ;;  %v211_v21 = vld [vmem:[%s1422_s2 + $0x30] sm:$0xff] }
  0x2b   : > { %982 = vmatmul.mubr.msk.f32.gmra.mrb[4].mxu0 %vm295_vm0, %v835_v22  ;;  %728 = vperm.xlu0 %1157, %v236_v32   ;;  %v212_v22 = vld [vmem:[%s1422_s2 + $0x38] sm:$0xf] }
  0x2c   : > { %984 = vmatprep.mubr.msk.f32.mxu0 %vm295_vm0, %v836_v23  ;;  %723 = vperm.xlu1 %1158, %v235_v31  }
  0x2f   : > { %985 = vmatmul.mubr.msk.f32.gmra.mrb[6].mxu0 %vm295_vm0, %v837_v24  ;;  %738 = vperm.xlu0 %1157, %v238_v34  }
  0x30   : > { %1003 = vmatprep.mubr.msk.f32.mxu0 %vm295_vm0, %v205_v25  ;;  %733 = vperm.xlu1 %1158, %v237_v33  }
  0x85   : > { %v1119_v36 = vpop.permute.xlu0 %1118 }
  0x86   : > { %v1121_v37 = vunpack.i.h.bf16 %v1119_v36  ;;  %v1120_v38 = vunpack.i.l.bf16 %v1119_v36  ;;  %v1129_v39 = vpop.permute.xlu1 %1128 }
  0x87   : > { %v1131_v41 = vunpack.i.h.bf16 %v1129_v39  ;;  %v1130_v42 = vunpack.i.l.bf16 %v1129_v39 }
  0x88   : > { %v1015_v43 = vpack.c.bf16 %v1121_v37, %v1120_v38 }
  0x89   : > { %v1124_v44 = vpop.permute.xlu0 %1123  ;;  %v1027_v49 = vpack.c.bf16 %v1131_v41, %v1130_v42 }
  0x8a   : > { %v1126_v45 = vunpack.i.h.bf16 %v1124_v44  ;;  %v1125_v46 = vunpack.i.l.bf16 %v1124_v44  ;;  %1017 = vmatprep.subr.msk.bf16.mxu1 %vm1282_vm5, %v1015_v43  ;;  %v1134_v47 = vpop.permute.xlu1 %1133 }
  0x8b   : > { %1020 = vmatpush3.bf16.msk.msra.mxu1 %vm1282_vm5, %v1015_v43  ;;  %v1135_v48 = vunpack.i.l.bf16 %v1134_v47  ;;  %v1136_v51 = vunpack.i.h.bf16 %v1134_v47 }
  0x8c   : > { %v1021_v50 = vpack.c.bf16 %v1126_v45, %v1125_v46 }
  0x8d   : > { %v270_v52 = vsel %vm203_vm4, %v1135_v48, 0.0  ;;  %v1139_v53 = vpop.permute.xlu0 %1138 }
  0x8e   : > { %v1141_v54 = vunpack.i.h.bf16 %v1139_v53  ;;  %v1140_v55 = vunpack.i.l.bf16 %v1139_v53  ;;  %1023 = vmatprep.subr.msk.bf16.mxu1 %vm1282_vm5, %v1021_v50  ;;  %v1144_v56 = vpop.permute.xlu1 %1143  ;;  %v1033_v60 = vpack.c.bf16 %v270_v52, %v1136_v51 }
  0x8f   : > { %1026 = vmatpush3.bf16.msk.msra.mxu1 %vm1282_vm5, %v1021_v50  ;;  %v1146_v58 = vunpack.i.h.bf16 %v1144_v56  ;;  %v1145_v59 = vunpack.i.l.bf16 %v1144_v56 }
  0x90   : > { %v1057_v61 = vpack.c.bf16 %v1141_v54, %v1140_v55  ;;  %1029 = vmatprep.subr.msk.bf16.mxu1 %vm1282_vm5, %v1027_v49 }
  0x91   : > { %v1063_v62 = vpack.c.bf16 %v1146_v58, %v1145_v59  ;;  %v1149_v63 = vpop.permute.xlu0 %1148 }
  0x92   : > { %1059 = vmatprep.subr.msk.bf16.mxu0 %vm1295_vm7, %v1057_v61  ;;  %v1151_v0 = vunpack.i.h.bf16 %v1149_v63  ;;  %v1150_v1 = vunpack.i.l.bf16 %v1149_v63  ;;  %v1154_v2 = vpop.permute.xlu1 %1153 }
  0x93   : > { %1032 = vmatpush3.bf16.msk.msra.mxu1 %vm1282_vm5, %v1027_v49  ;;  %1062 = vmatpush3.bf16.msk.msra.mxu0 %vm1295_vm7, %v1057_v61  ;;  %v1155_v3 = vunpack.i.l.bf16 %v1154_v2  ;;  %v1156_v5 = vunpack.i.h.bf16 %v1154_v2 }
  0x94   : > { %v1069_v4 = vpack.c.bf16 %v1151_v0, %v1150_v1  ;;  %1035 = vmatprep.subr.msk.bf16.mxu1 %vm1034_vm8, %v1033_v60  ;;  %1065 = vmatprep.subr.msk.bf16.mxu0 %vm1295_vm7, %v1063_v62 }
  0x95   : > { %v294_v6 = vsel %vm204_vm6, %v1155_v3, 0.0 }
  0x96   : > { %v1075_v8 = vpack.c.bf16 %v294_v6, %v1156_v5 }
  0x97   : > { %1038 = vmatpush3.bf16.msk.msra.mxu1 %vm1034_vm8, %v1033_v60  ;;  %1068 = vmatpush3.bf16.msk.msra.mxu0 %vm1295_vm7, %v1063_v62 }
  0x98   : > { %1081 = vmatprep.subr.msk.bf16.mxu1 %vm1295_vm7, %v1057_v61  ;;  %1071 = vmatprep.subr.msk.bf16.mxu0 %vm1295_vm7, %v1069_v4 }
  0x9a   : > { %948 = vmatmul.mubr.msk.f32.vlgmr.msra.gmra.mrb[0].mxu1 %vm295_vm0, %v823_v7 }
  0x9b   : > { %1085 = vmatpush3.bf16.msk.msra.mxu1 %vm1295_vm7, %v1057_v61  ;;  %1074 = vmatpush3.bf16.msk.msra.mxu0 %vm1295_vm7, %v1069_v4 }
  0x9c   : > { %950 = vmatprep.mubr.msk.f32.mxu1 %vm295_vm0, %v824_v9  ;;  %1082 = vmatprep.subr.msk.bf16.mxu1 %vm1295_vm7, %v1063_v62 }
  0x9d   : > { %1077 = vmatprep.subr.msk.bf16.mxu0 %vm1329_vm9, %v1075_v8 }
  0x9e   : > { %951 = vmatmul.mubr.msk.f32.gmra.mrb[2].mxu1 %vm295_vm0, %v825_v11 }
  0x9f   : > { %1086 = vmatpush3.bf16.msk.msra.mxu1 %vm1295_vm7, %v1063_v62  ;;  %1080 = vmatpush3.bf16.msk.msra.mxu0 %vm1329_vm9, %v1075_v8 }
  0xa0   : > { %953 = vmatprep.mubr.msk.f32.mxu1 %vm295_vm0, %v826_v12  ;;  %1083 = vmatprep.subr.msk.bf16.mxu1 %vm1295_vm7, %v1069_v4 }
  0xa2   : > { %954 = vmatmul.mubr.msk.f32.gmra.mrb[4].mxu1 %vm295_vm0, %v827_v13  ;;  %1004 = vmatmul.mubr.msk.f32.vlgmr.msra.gmra.mrb[0].mxu0 %vm295_vm0, %v206_v14  ;;  %v704_v29 = vpop.permute.xlu0 %703 }
  0xa3   : > { %1087 = vmatpush3.bf16.msk.msra.mxu1 %vm1295_vm7, %v1069_v4  ;;  %956 = vmatprep.mubr.msk.f32.mxu1 %vm295_vm0, %v828_v15  ;;  %v709_v31 = vpop.permute.xlu1 %708 }
  0xa4   : > { %1084 = vmatprep.subr.msk.bf16.mxu1 %vm1329_vm9, %v1075_v8  ;;  %1006 = vmatprep.mubr.msk.f32.mxu0 %vm295_vm0, %v207_v16 }
  0xa6   : > { %957 = vmatmul.mubr.msk.f32.gmra.mrb[6].mxu1 %vm295_vm0, %v829_v17  ;;  %1007 = vmatmul.mubr.msk.f32.gmra.mrb[2].mxu0 %vm295_vm0, %v208_v18  ;;  %v719_v39 = vpop.permute.xlu0 %718 }
  0xa7   : > { %1088 = vmatpush3.bf16.msk.msra.mxu1 %vm1329_vm9, %v1075_v8  ;;  %1009 = vmatprep.mubr.msk.f32.mxu1 %vm295_vm0, %v209_v19  ;;  %v714_v42 = vpop.permute.xlu1 %713 }
  0xaa   : > { %1010 = vmatmul.mubr.msk.f32.vlgmr.msra.gmra.mrb[8].mxu1 %vm295_vm0, %v210_v20  ;;  %v729_v54 = vpop.permute.xlu0 %728 }
  0xab   : > { %1012 = vmatprep.mubr.msk.f32.mxu1 %vm295_vm0, %v211_v21  ;;  %v724_v57 = vpop.permute.xlu1 %723 }
  0xae   : > { %1013 = vmatmul.mubr.msk.f32.gmra.mrb[10].mxu1 %vm295_vm0, %v212_v22  ;;  %v739_v2 = vpop.permute.xlu0 %738 }
  0xaf   : > { %v734_v4 = vpop.permute.xlu1 %733 }
  0xfe   : > { %v983_v23 = vpop.f32.mrb[4].mxu0 }
  0xff   : > { %v542_v24 = vpop.f32.mrb[5].mxu0 }
 0x102   : > { %v986_v25 = vpop.f32.mrb[6].mxu0 }
 0x103   : > { %v552_v26 = vpop.f32.mrb[7].mxu0 }
 0x16d   : > { %v949_v27 = vpop.f32.mrb[0].mxu1 }
 0x16e   : > { %v390_v28 = vpop.f32.mrb[1].mxu1 }
 0x171   : > { %v952_v30 = vpop.f32.mrb[2].mxu1 }
 0x172   : > { %v400_v32 = vpop.f32.mrb[3].mxu1 }
 0x175   : > { %v955_v33 = vpop.f32.mrb[4].mxu1  ;;  %v1005_v34 = vpop.f32.mrb[0].mxu0 }
 0x176   : > { %v548_v35 = vadd.f32 %v983_v23, %v955_v33  ;;  %v1089_v36 = vadd.f32 %v1005_v34, %v949_v27  ;;  %v410_v37 = vpop.f32.mrb[5].mxu1  ;;  %v654_v38 = vpop.f32.mrb[1].mxu0 }
 0x177   : > { %v543_v40 = vadd.f32 %v542_v24, %v410_v37  ;;  %v1090_v41 = vadd.f32 %v654_v38, %v390_v28 }
 0x178   : > { %v742_v43 = vadd.f32 %v1089_v36, %v709_v31 }
 0x179   : > { %v741_v44 = vadd.f32 %v1090_v41, %v704_v29  ;;  %v958_v45 = vpop.f32.mrb[6].mxu1  ;;  %v1008_v46 = vpop.f32.mrb[2].mxu0 }
 0x17a   : > { %750 = vst [vmem:[%s1407_s22 + $0x8] sm:$0xff] %v742_v43  ;;  %v558_v47 = vadd.f32 %v986_v25, %v958_v45  ;;  %v1091_v48 = vadd.f32 %v1008_v46, %v952_v30  ;;  %v420_v49 = vpop.f32.mrb[7].mxu1  ;;  %v664_v50 = vpop.f32.mrb[3].mxu0 }
 0x17b   : > { %749 = vst [vmem:[%s1407_s22] sm:$0xff] %v741_v44  ;;  %v553_v51 = vadd.f32 %v552_v26, %v420_v49  ;;  %v1092_v52 = vadd.f32 %v664_v50, %v400_v32 }
 0x17c   : > { %v744_v53 = vadd.f32 %v1091_v48, %v719_v39 }
 0x17d   : > { %v743_v55 = vadd.f32 %v1092_v52, %v714_v42  ;;  %v1011_v56 = vpop.f32.mrb[8].mxu1 }
 0x17e   : > { %752 = vst [vmem:[%s1407_s22 + $0x18] sm:$0xff] %v744_v53  ;;  %v698_v58 = vadd.f32 %v1011_v56, %v548_v35  ;;  %v674_v59 = vpop.f32.mrb[9].mxu1 }
 0x17f   : > { %751 = vst [vmem:[%s1407_s22 + $0x10] sm:$0xff] %v743_v55  ;;  %v697_v60 = vadd.f32 %v674_v59, %v543_v40 }
 0x180   : > { %v746_v61 = vadd.f32 %v729_v54, %v698_v58 }
 0x181   : > { %v745_v62 = vadd.f32 %v724_v57, %v697_v60  ;;  %v1014_v63 = vpop.f32.mrb[10].mxu1 }
 0x182   : > { %754 = vst [vmem:[%s1407_s22 + $0x28] sm:$0xff] %v746_v61  ;;  %v700_v0 = vadd.f32 %v1014_v63, %v558_v47  ;;  %v684_v1 = vpop.f32.mrb[11].mxu1 }
 0x183   : > { %753 = vst [vmem:[%s1407_s22 + $0x20] sm:$0xff] %v745_v62  ;;  %v699_v3 = vadd.f32 %v684_v1, %v553_v51 }
 0x184   : > { %v748_v5 = vadd.f32 %v739_v2, %v700_v0 }
 0x185   : > { %v747_v6 = vadd.f32 %v734_v4, %v699_v3 }
 0x186   : > { %756 = vst [vmem:[%s1407_s22 + $0x38] sm:$0xf] %v748_v5 }
 0x187   : > { %755 = vst [vmem:[%s1407_s22 + $0x30] sm:$0xff] %v747_v6 }
 0x188 PF: > { %s14_s15 = sadd.s32 1, %s1165_s15  }
 0x189   : > { %p11_p4 = scmp.ge.s32.totalorder %s14_s15, 4  }
 0x18b   :  { %13 = sbr.rel (!%p11_p4) target bundleno = 1 (0x1), region = 68 }

</bundles_post_ra>
